<compile_context>
chip_gen: v6e
topology: v6e:2x2x1
jax: 0.10.0
libtpu: 0.0.40
codegen_flags: <defaults>
</compile_context>

<pallas_src>
import functools

import jax
import jax.numpy as jnp
from jax.experimental import pallas as pl
from jax.experimental.pallas import tpu as pltpu


def _conv_bn_relu_pool_kernel(x_ref, wc_ref, bc_ref, out_ref, acc_ref, *,
                              inv_hw, b_blk):
    # x_ref:   (b_blk, C, hw_tile)  NCHW block: channels on sublanes, spatial on lanes
    # wc_ref:  (C_in, C_out)        conv weight with BN scale folded in (compute dtype)
    # bc_ref:  (1, C_out) f32       conv bias with BN folded in
    # out_ref: (1, b_blk, C)        pooled features, committed at last HW step
    # acc_ref: (b_blk, C) f32       running per-channel spatial sum (VMEM scratch)
    j = pl.program_id(1)

    @pl.when(j == 0)
    def _init():
        acc_ref[...] = jnp.zeros_like(acc_ref)

    w = wc_ref[...]
    bias = bc_ref[...]

    for b in range(b_blk):  # static unroll, b_blk kept <= 8
        # On-chip relayout: (C, hw_tile) -> (hw_tile, C) so channels sit on lanes
        # and the 1x1 conv is a plain (hw_tile, 256) @ (256, 256) MXU matmul.
        xbt = x_ref[b].T
        y = jnp.dot(xbt, w, preferred_element_type=jnp.float32)
        y = jnp.maximum(y + bias, 0.0)                                # bias + ReLU (f32)
        acc_ref[b:b + 1, :] += jnp.sum(y, axis=0, keepdims=True)      # partial spatial sum

    @pl.when(j == pl.num_programs(1) - 1)
    def _store():
        out_ref[0] = acc_ref[...] * inv_hw                            # lane-dense (b_blk, 256)


def _choose_tiles(N, HW, itemsize, *, target_block_bytes=1 << 20, max_unroll=8):
    """Pick (b_blk, hw_tile) so each x block is ~1 MiB and >=2 parallel blocks exist."""
    C = 256
    target_rows = max(128, target_block_bytes // (C * itemsize))

    # HW tiling only when HW is large and 128-divisible (BlockSpec (8,128) rule:
    # the last block dim must be a multiple of 128 or equal the full dim).
    hw_tile = HW
    if HW % 128 == 0 and HW > target_rows:
        t = max(128, (target_rows // 128) * 128)
        while HW % t != 0:
            t -= 128
        hw_tile = t

    # Batch blocking: fill remaining rows, bound the static unroll, keep >=2
    # blocks on the parallel axis (v7x megacore), and require b_blk | N so no
    # batch-padding copy of x is needed.
    b_blk = max(1, target_rows // hw_tile)
    b_blk = min(b_blk, max_unroll, N)
    if N >= 2:
        b_blk = min(b_blk, -(-N // 2))  # ceil(N/2) -> at least 2 batch blocks
    while N % b_blk != 0:
        b_blk -= 1
    return b_blk, hw_tile


def classifier0_forward(x_nchw, params, *, target_block_bytes=1 << 20):
    """x_nchw: (N, 256, H, W) in f32 or bf16 -> (N, n_classes) float32."""
    N, C, H, W = x_nchw.shape
    HW = H * W
    cdt = x_nchw.dtype
    itemsize = jnp.dtype(cdt).itemsize

    # Fold eval-mode BatchNorm into the conv weight/bias (exact: all linear pre-ReLU).
    wc_eff = (params["wc"] * params["scale"]).astype(cdt)                     # (C_in, C_out)
    bc_eff = (params["bc"] * params["scale"] + params["shift"]).astype(jnp.float32)

    # Free view only — no XLA transpose, no XLA dtype cast of x.
    x = x_nchw.reshape(N, C, HW)

    b_blk, hw_tile = _choose_tiles(N, HW, itemsize,
                                   target_block_bytes=target_block_bytes)
    n_bblocks = N // b_blk
    n_hwblocks = HW // hw_tile
    x_block_bytes = b_blk * C * hw_tile * itemsize

    kernel = functools.partial(_conv_bn_relu_pool_kernel,
                               inv_hw=1.0 / float(HW), b_blk=b_blk)

    pooled = pl.pallas_call(
        kernel,
        out_shape=jax.ShapeDtypeStruct((n_bblocks, b_blk, C), jnp.float32),
        grid_spec=pltpu.PrefetchScalarGridSpec(
            num_scalar_prefetch=0,
            grid=(n_bblocks, n_hwblocks),
            in_specs=[
                pl.BlockSpec((b_blk, C, hw_tile), lambda i, j: (i, 0, j)),   # x (NCHW view)
                pl.BlockSpec((C, C), lambda i, j: (0, 0)),                   # folded conv W
                pl.BlockSpec((1, C), lambda i, j: (0, 0)),                   # folded conv b
            ],
            out_specs=pl.BlockSpec((1, b_blk, C), lambda i, j: (i, 0, 0)),   # pooled feats
            scratch_shapes=[pltpu.VMEM((b_blk, C), jnp.float32)],            # pool accumulator
        ),
        compiler_params=pltpu.CompilerParams(
            dimension_semantics=("parallel", "arbitrary"),                   # batch || HW-reduce
            # Only bumped for pathological (large, non-128-divisible) HW where the
            # whole spatial extent must live in one block (v5e default is 16 MiB).
            vmem_limit_bytes=(48 << 20) if x_block_bytes > (4 << 20) else None,
        ),
    )(x, wc_eff, bc_eff)

    pooled = pooled.reshape(N, C)                                            # (N, 256) f32

    # Final Linear(256, n_classes) once over the whole batch, in XLA (lane-dense,
    # avoids masked partial stores / a serialized GEMV inside the kernel).
    return pooled @ params["wl"] + params["bl"]


def init_params(key, n_classes, C=256, eps=1e-5):
    """Deterministic synthetic parameters matching the module's shapes."""
    k1, k2, k3, k4 = jax.random.split(key, 4)

    # Conv2d(256, 256, 1): PyTorch weight (out_c, in_c, 1, 1); stored as (in_c, out_c).
    wc_pt = jax.random.normal(k1, (C, C), jnp.float32) * 0.05
    wc = wc_pt.T
    bc = (jax.random.normal(k2, (C,), jnp.float32) * 0.05).reshape(1, C)

    # BatchNorm2d(256), eval mode, default init: gamma=1, beta=0, mean=0, var=1.
    gamma = jnp.ones((C,), jnp.float32)
    beta = jnp.zeros((C,), jnp.float32)
    running_mean = jnp.zeros((C,), jnp.float32)
    running_var = jnp.ones((C,), jnp.float32)
    scale = (gamma / jnp.sqrt(running_var + eps)).reshape(1, C)
    shift = (beta - running_mean * scale[0]).reshape(1, C)

    # Linear(256, n_classes): PyTorch weight (n_classes, 256); stored transposed.
    wl_pt = jax.random.normal(k3, (n_classes, C), jnp.float32) * 0.05
    wl = wl_pt.T
    bl = (jax.random.normal(k4, (n_classes,), jnp.float32) * 0.05).reshape(1, n_classes)

    return {"wc": wc, "bc": bc, "scale": scale, "shift": shift, "wl": wl, "bl": bl}


def _reference_forward(x_nchw, params):
    """Pure-JAX f32 reference mirroring the PyTorch forward (eval-mode BN)."""
    N, C, H, W = x_nchw.shape
    x = jnp.transpose(x_nchw, (0, 2, 3, 1)).reshape(N, H * W, C).astype(jnp.float32)
    y = x @ params["wc"] + params["bc"]
    y = y * params["scale"] + params["shift"]
    y = jnp.maximum(y, 0.0)
    pooled = jnp.mean(y, axis=1)
    return pooled @ params["wl"] + params["bl"]


if __name__ == "__main__":
    key = jax.random.PRNGKey(0)
    kx, kp = jax.random.split(key)

    N, C, H, W = 2, 256, 8, 8          # channels fixed at 256 by the module
    n_classes = 16

    x = jax.random.normal(kx, (N, C, H, W), jnp.float32)
    params = init_params(kp, n_classes, C=C)
    ref = _reference_forward(x, params)

    # f32 path: exact-semantics check (2 parallel batch blocks, single HW block).
    out = jax.block_until_ready(classifier0_forward(x, params))
    assert out.shape == (N, n_classes)
    assert jnp.allclose(out, ref, atol=1e-4, rtol=1e-4), "f32 mismatch vs reference"

    # bf16 activations (recommended on v5e/v6e/v7x: halves DMA bytes, f32 MXU acc).
    x_bf16 = x.astype(jnp.bfloat16)
    ref_bf16 = _reference_forward(x_bf16, params)
    out_bf16 = jax.block_until_ready(classifier0_forward(x_bf16, params))
    assert out_bf16.shape == (N, n_classes)
    assert jnp.allclose(out_bf16, ref_bf16, atol=1e-1, rtol=1e-1), "bf16 mismatch"

    # Multi-batch-per-block path (b_blk = 2) forced via a small block budget.
    x4 = jax.random.normal(jax.random.PRNGKey(1), (4, C, H, W), jnp.float32)
    ref4 = _reference_forward(x4, params)
    out4 = jax.block_until_ready(
        classifier0_forward(x4, params, target_block_bytes=1 << 17))
    assert jnp.allclose(out4, ref4, atol=1e-4, rtol=1e-4), "b_blk>1 mismatch"

    # HW-tiled reduction path (n_hwblocks = 2) forced via a small block budget.
    x16 = jax.random.normal(jax.random.PRNGKey(2), (2, C, 16, 16), jnp.float32)
    ref16 = _reference_forward(x16, params)
    out16 = jax.block_until_ready(
        classifier0_forward(x16, params, target_block_bytes=1 << 17))
    assert jnp.allclose(out16, ref16, atol=1e-4, rtol=1e-4), "HW-tiled mismatch"

    print("KERNEL_OK")
</pallas_src>

<mosaic_0001>
module attributes {stable_mosaic.version = 11 : i64} {
  func.func @_conv_bn_relu_pool_kernel(%arg0: i32, %arg1: i32, %arg2: memref<1x256x64xf32, #tpu.memory_space<vmem>>, %arg3: memref<256x256xf32, #tpu.memory_space<vmem>>, %arg4: memref<1x256xf32, #tpu.memory_space<vmem>>, %arg5: memref<1x1x256xf32, #tpu.memory_space<vmem>>, %arg6: memref<1x256xf32, #tpu.memory_space<vmem>>) attributes {dimension_semantics = [#tpu.dimension_semantics<parallel>, #tpu.dimension_semantics<arbitrary>], iteration_bounds = array<i64: 2, 1>, scalar_prefetch = 0 : i64, scratch_operands = 1 : i64, tpu.core_type = #tpu.core_type<tc>, window_params = [{transform_indices = @transform_0, window_bounds = array<i64: 1, 256, 64>}, {pipeline_mode = #tpu.pipeline_mode<synchronous>, transform_indices = @transform_1, window_bounds = array<i64: 256, 256>}, {pipeline_mode = #tpu.pipeline_mode<synchronous>, transform_indices = @transform_2, window_bounds = array<i64: 1, 256>}, {transform_indices = @transform_3, window_bounds = array<i64: 1, 1, 256>}]} {
    %c0_i32 = arith.constant 0 : i32
    %0 = arith.cmpi eq, %arg1, %c0_i32 : i32
    %1 = arith.extui %0 : i1 to i32
    %c0_i32_0 = arith.constant 0 : i32
    %2 = arith.cmpi ne, %1, %c0_i32_0 : i32
    scf.if %2 {
      %cst_15 = arith.constant 0.000000e+00 : f32
      %21 = vector.broadcast %cst_15 : f32 to vector<1x256xf32>
      %c0_16 = arith.constant 0 : index
      %c0_17 = arith.constant 0 : index
      %22 = vector.load %arg6[%c0_16, %c0_17] : memref<1x256xf32, #tpu.memory_space<vmem>>, vector<1x256xf32>
      tpu.vector_store %arg6[%c0_16, %c0_17], %21 {strides = array<i32>} : memref<1x256xf32, #tpu.memory_space<vmem>>, vector<1x256xf32>,
    } else {
    }
    %c0 = arith.constant 0 : index
    %c0_1 = arith.constant 0 : index
    %3 = vector.load %arg3[%c0, %c0_1] : memref<256x256xf32, #tpu.memory_space<vmem>>, vector<256x256xf32>
    %c0_2 = arith.constant 0 : index
    %c0_3 = arith.constant 0 : index
    %4 = vector.load %arg4[%c0_2, %c0_3] : memref<1x256xf32, #tpu.memory_space<vmem>>, vector<1x256xf32>
    %c0_4 = arith.constant 0 : index
    %c0_5 = arith.constant 0 : index
    %c0_6 = arith.constant 0 : index
    %5 = vector.load %arg2[%c0_4, %c0_5, %c0_6] : memref<1x256x64xf32, #tpu.memory_space<vmem>>, vector<1x256x64xf32>
    %6 = vector.shape_cast %5 : vector<1x256x64xf32> to vector<256x64xf32>
    %7 = tpu.transpose %6, [1, 0] : vector<256x64xf32> -> vector<64x256xf32>
    %cst = arith.constant dense<0.000000e+00> : vector<64x256xf32>
    %8 = tpu.matmul %7, %3, %cst {dimension_numbers = #tpu.dot_dimension_numbers<[1], [0], [0], [1], [0, 0, 1, 1], [], []>} : vector<64x256xf32>, vector<256x256xf32>, vector<64x256xf32> -> vector<64x256xf32>
    %9 = vector.broadcast %4 : vector<1x256xf32> to vector<64x256xf32>
    %10 = arith.addf %8, %9 : vector<64x256xf32>
    %cst_7 = arith.constant 0.000000e+00 : f32
    %11 = vector.broadcast %cst_7 : f32 to vector<64x256xf32>
    %12 = arith.maximumf %10, %11 : vector<64x256xf32>
    %c0_8 = arith.constant 0 : index
    %c0_9 = arith.constant 0 : index
    %13 = vector.load %arg6[%c0_8, %c0_9] : memref<1x256xf32, #tpu.memory_space<vmem>>, vector<1x256xf32>
    %cst_10 = arith.constant dense<0.000000e+00> : vector<256xf32>
    %14 = vector.multi_reduction <add>, %12, %cst_10 [0] : vector<64x256xf32> to vector<256xf32>
    %15 = vector.shape_cast %14 : vector<256xf32> to vector<1x256xf32>
    %16 = arith.addf %13, %15 : vector<1x256xf32>
    %c0_11 = arith.constant 0 : index
    %c0_12 = arith.constant 0 : index
    %17 = vector.load %arg6[%c0_11, %c0_12] : memref<1x256xf32, #tpu.memory_space<vmem>>, vector<1x256xf32>
    tpu.vector_store %arg6[%c0_11, %c0_12], %16 {strides = array<i32>} : memref<1x256xf32, #tpu.memory_space<vmem>>, vector<1x256xf32>,
    %c0_i32_13 = arith.constant 0 : i32
    %18 = arith.cmpi eq, %arg1, %c0_i32_13 : i32
    %19 = arith.extui %18 : i1 to i32
    %c0_i32_14 = arith.constant 0 : i32
    %20 = arith.cmpi ne, %19, %c0_i32_14 : i32
    scf.if %20 {
      %c0_15 = arith.constant 0 : index
      %c0_16 = arith.constant 0 : index
      %21 = vector.load %arg6[%c0_15, %c0_16] : memref<1x256xf32, #tpu.memory_space<vmem>>, vector<1x256xf32>
      %cst_17 = arith.constant 1.562500e-02 : f32
      %22 = vector.broadcast %cst_17 : f32 to vector<1x256xf32>
      %23 = arith.mulf %21, %22 : vector<1x256xf32>
      %c0_18 = arith.constant 0 : index
      %c0_19 = arith.constant 0 : index
      %c0_20 = arith.constant 0 : index
      %24 = vector.load %arg5[%c0_18, %c0_19, %c0_20] : memref<1x1x256xf32, #tpu.memory_space<vmem>>, vector<1x1x256xf32>
      %25 = vector.shape_cast %24 : vector<1x1x256xf32> to vector<1x256xf32>
      %26 = vector.shape_cast %23 : vector<1x256xf32> to vector<1x1x256xf32>
      tpu.vector_store %arg5[%c0_18, %c0_19, %c0_20], %26 {strides = array<i32>} : memref<1x1x256xf32, #tpu.memory_space<vmem>>, vector<1x1x256xf32>,
    } else {
    }
    return
  }
  func.func @transform_0(%arg0: i32, %arg1: i32) -> (i32, i32, i32) {
    %c0_i32 = arith.constant 0 : i32
    %c0_i32_0 = arith.constant 0 : i32
    return %arg0, %c0_i32, %arg1 : i32, i32, i32
  }
  func.func @transform_1(%arg0: i32, %arg1: i32) -> (i32, i32) {
    %c0_i32 = arith.constant 0 : i32
    %c0_i32_0 = arith.constant 0 : i32
    %c0_i32_1 = arith.constant 0 : i32
    return %c0_i32, %c0_i32_0 : i32, i32
  }
  func.func @transform_2(%arg0: i32, %arg1: i32) -> (i32, i32) {
    %c0_i32 = arith.constant 0 : i32
    %c0_i32_0 = arith.constant 0 : i32
    %c0_i32_1 = arith.constant 0 : i32
    return %c0_i32, %c0_i32_0 : i32, i32
  }
  func.func @transform_3(%arg0: i32, %arg1: i32) -> (i32, i32, i32) {
    %c0_i32 = arith.constant 0 : i32
    %c0_i32_0 = arith.constant 0 : i32
    %c0_i32_1 = arith.constant 0 : i32
    return %arg0, %c0_i32, %c0_i32_0 : i32, i32, i32
  }
}

</mosaic_0001>

<bundles_post_ra>
// kernel: tpu_custom_call.1
= control target key start
LH: loop header
LB: loop body
LE: loop exit
PB: predicated region body
PF: predicated region fallthrough
CT: control target
= control target key end

     0   :  { %8 = vsyncpa [#allocation4], 0  ;;  %s1303_s0 = inlined_call_operand.vmem [shape: f32[2,256,64], index: 0, kind: input, shape index: {}]   ;;  %s1304_s1 = inlined_call_operand.vmem [shape: f32[256,256], index: 1, kind: input, shape index: {}]   ;;  %s1305_s2 = inlined_call_operand.vmem [shape: f32[1,256], index: 2, kind: input, shape index: {}]   ;;  %s1306_s3 = inlined_call_operand.hbm [shape: f32[2,1,256], index: 3, kind: output, shape index: {}]  }
   0x1   :  { %10 = vsyncpa [#allocation4 + $0x1], 0  ;;  %s956_s12 = smov 0   ;;  %s958_s13 = smov 0  }
   0x2   :  { %s960_s14 = smov 0   ;;  %s962_s15 = smov 0  }
   0x3   :  { %s964_s16 = smov 0   ;;  %s966_s17 = smov 0  }
   0x4 LB: > { %s647_s18 = sadd.s32 4294967295, %s931_s17   ;;  %s648_s19 = sadd.s32 4294967294, %s931_s17   ;;  %s931_s17 = sphi %s966_s17, %s16_s17   ;;  %s927_s16 = sphi %s964_s16, %s1315_s16   ;;  %s923_s15 = sphi %s962_s15, %s1314_s15   ;;  %s919_s14 = sphi %s960_s14, %s1313_s14   ;;  %s915_s13 = sphi %s958_s13, %s1312_s13   ;;  %s911_s12 = sphi %s956_s12, %s1311_s12  }
   0x5   : > { %s28_s20 = sadd.s32 1, %s927_s16  ;;  %s105_s21 = sadd.s32 1, %s919_s14 }
   0x6   : > { %p30_p0 = scmp.ge.s32.totalorder %s28_s20, 2  ;;  %p115_p1 = scmp.ne.s32.totalorder %s919_s14, %s915_s13 }
   0x7   : > { %p116_p2 = scmp.eq.s32.totalorder %s647_s18, 1  ;;  %p121_p3 = scmp.ne.s32.totalorder %s915_s13, %s911_s12 }
   0x8   : > { %s1317_s20 = smov (%p30_p0, %s28_s20), 0  ;;  %p122_p5 = scmp.eq.s32.totalorder %s648_s19, 1 }
   0x9   : > { %p996_p4 = por %p116_p2, %p115_p1  ;;  %s102_s23 = ssub.s32 %s927_s16, %s1317_s20 }
   0xa   : > { %p651_p6 = scmp.ge.s32.totalorder %s931_s17, 1  ;;  %p103_p7 = scmp.eq.s32.totalorder %s102_s23, 0 }
   0xb   : > { %p1003_p8 = por %p122_p5, %p121_p3  ;;  %p157_p9 = scmp.lt.s32.totalorder %s931_s17, 3 }
   0xc   : > { %s1009_s25 = scalar_select %p103_p7, %s919_s14, %s105_s21  }
   0xd   : > { %p158_p10 = pnand %p651_p6, %p157_p9 }
   0xe   : > { %p184_p11 = scmp.lt.s32.totalorder (!%p158_p10), %s923_s15, 1  ;;  %s181_s4 = sand.u32 (!%p158_p10), 1, %s915_s13  }
   0xf   : > { %161 = sbr.rel (%p158_p10) target bundleno = 429 (0x1ad), region = 32  ;;  %s652_s5 = sshll.u32 (!%p158_p10), %s181_s4, 1 }
  0x10   : > { %s661_s6 = sshll.u32 (!%p158_p10), %s923_s15, 5  ;;  %s935_s21 = smov (!%p158_p10), [#allocation3]  }
  0x11   : > { %s572_s11 = scalar_lea.hbm (!%p158_p10), %s1306_s3, %s661_s6 }
  0x14   : > { %v232_v0 = vld [vmem:[%s1304_s1 + $0xf8] sm:$0xff]  ;;  %v231_v1 = vld [vmem:[%s1304_s1 + $0xf0] sm:$0xff]  ;;  %v230_v2 = vld [vmem:[%s1304_s1 + $0xe8] sm:$0xff]  ;;  %s185_s7 = scalar_select %p184_p11, %s923_s15, 1 }
  0x15   : > { %373 = vmatprep.subr.mxu0 %v232_v0  ;;  %v229_v3 = vld [vmem:[%s1304_s1 + $0xe0] sm:$0xff]  ;;  %662 = vmatprep.subr.mxu1 %v232_v0  ;;  %v228_v4 = vld [vmem:[%s1304_s1 + $0xd8] sm:$0xff]  ;;  %v227_v5 = vld [vmem:[%s1304_s1 + $0xd0] sm:$0xff]  ;;  %s859_s15 = sshll.u32 %s935_s21, 4  ;;  %s860_s15 = int_to_ptr.vmem [resolvable:$false] %s859_s15 }
  0x16   : > { %374 = vmatpush1.msra.mxu0 %v231_v1  ;;  %694 = vmatpush1.msra.mxu1 %v231_v1  ;;  %s660_s18 = sshll.u32 %s185_s7, 8  ;;  %v226_v6 = vld [vmem:[%s1304_s1 + $0xc8] sm:$0xff]  ;;  %v225_v7 = vld [vmem:[%s1304_s1 + $0xc0] sm:$0xff]  ;;  %v224_v8 = vld [vmem:[%s1304_s1 + $0xb8] sm:$0xff]  ;;  %s183_s7 = scalar_lea.vmem [#allocation3], %s652_s5 }
  0x17   : > { %375 = vmatprep.subr.mxu0 %v230_v2  ;;  %663 = vmatprep.subr.mxu1 %v230_v2  ;;  %s1037_s27 = scalar_lea.vmem %s1303_s0, %s660_s18  ;;  %v223_v14 = vld [vmem:[%s1304_s1 + $0xb0] sm:$0xff]  ;;  %v222_v15 = vld [vmem:[%s1304_s1 + $0xa8] sm:$0xff]  ;;  %v221_v17 = vld [vmem:[%s1304_s1 + $0xa0] sm:$0xff]  ;;  %s574_s8 = sshll.u32 %s183_s7, 4  ;;  %s575_s8 = int_to_ptr.vmem [resolvable:$true] %s574_s8 }
  0x18   : > { %376 = vmatpush1.msra.mxu0 %v229_v3  ;;  %695 = vmatpush1.msra.mxu1 %v229_v3  ;;  %v266_v9 = vld [vmem:[%s1037_s27] sm:$0xff]  ;;  %v267_v11 = vld [vmem:[%s1037_s27 + $0x8] sm:$0xff]  ;;  %v268_v18 = vld [vmem:[%s1037_s27 + $0x10] sm:$0xff]  ;;  %s560_s18 = scalar_lea.sflag [#allocation4], %s181_s4  ;;  %s855_s19 = scalar_lea.vmem %s575_s8, 32 }
  0x19   : > { %377 = vmatprep.subr.mxu0 %v228_v4  ;;  %664 = vmatprep.subr.mxu1 %v228_v4  ;;  %v282_v10 = vld [vmem:[%s1037_s27 + $0x80] sm:$0xff]  ;;  %v283_v13 = vld [vmem:[%s1037_s27 + $0x88] sm:$0xff]  ;;  %v284_v19 = vld [vmem:[%s1037_s27 + $0x90] sm:$0xff]  ;;  %p856_p12 = scmp.ne.s32.totalorder %s575_s8, %s855_s19  ;;  %s861_s23 = scalar_lea.vmem %s860_s15, 64 }
  0x1a   : > { %378 = vmatpush1.msra.mxu0 %v227_v5  ;;  %696 = vmatpush1.msra.mxu1 %v227_v5  ;;  %v783_v12 = vpack.i.bf16 %v266_v9, %v282_v10  ;;  %v785_v16 = vpack.i.bf16 %v267_v11, %v283_v13  ;;  %v220_v20 = vld [vmem:[%s1304_s1 + $0x98] sm:$0xff]  ;;  %v219_v21 = vld [vmem:[%s1304_s1 + $0x90] sm:$0xff]  ;;  %v218_v22 = vld [vmem:[%s1304_s1 + $0x88] sm:$0xff]  ;;  %v787_v23 = vpack.i.bf16 %v268_v18, %v284_v19  ;;  %p862_p1 = scmp.lt.s32.totalorder %s575_s8, %s860_s15  ;;  %p863_p2 = scmp.lt.s32.totalorder %s861_s23, %s855_s19 }
  0x1b   : > { %379 = vmatprep.subr.mxu0 %v226_v6  ;;  %665 = vmatprep.subr.mxu1 %v226_v6  ;;  %v217_v24 = vld [vmem:[%s1304_s1 + $0x80] sm:$0xff]  ;;  %v269_v25 = vld [vmem:[%s1037_s27 + $0x18] sm:$0xff]  ;;  %v215_v28 = vld [vmem:[%s1304_s1 + $0x70] sm:$0xff]  ;;  %p857_p13 = pnand %p856_p12, %p996_p4 }
  0x1c   : > { %380 = vmatpush1.msra.mxu0 %v225_v7  ;;  %697 = vmatpush1.msra.mxu1 %v225_v7  ;;  %v285_v26 = vld [vmem:[%s1037_s27 + $0x98] sm:$0xff]  ;;  %v214_v29 = vld [vmem:[%s1304_s1 + $0x68] sm:$0xff]  ;;  %v213_v31 = vld [vmem:[%s1304_s1 + $0x60] sm:$0xff]  ;;  %p864_p3 = por %p863_p2, %p862_p1 }
  0x1d   : > { %784 = vxpose.xlu0.b32.start [1/16] (narrow) %v783_v12, 64  ;;  %381 = vmatprep.subr.mxu0 %v224_v8  ;;  %v216_v27 = vld [vmem:[%s1304_s1 + $0x78] sm:$0xff]  ;;  %v789_v30 = vpack.i.bf16 %v269_v25, %v285_v26  ;;  %v270_v32 = vld [vmem:[%s1037_s27 + $0x20] sm:$0xff]  ;;  %v211_v35 = vld [vmem:[%s1304_s1 + $0x50] sm:$0xff]  ;;  %p858_p0 = pneg %p857_p13 }
  0x1e   : > { %382 = vmatpush1.msra.mxu0 %v223_v14  ;;  %666 = vmatprep.subr.mxu1 %v224_v8  ;;  %v286_v33 = vld [vmem:[%s1037_s27 + $0xa0] sm:$0xff]  ;;  %v212_v34 = vld [vmem:[%s1304_s1 + $0x58] sm:$0xff]  ;;  %v210_v36 = vld [vmem:[%s1304_s1 + $0x48] sm:$0xff] }
  0x1f   : > { %383 = vmatprep.subr.mxu0 %v222_v15  ;;  %698 = vmatpush1.msra.mxu1 %v223_v14  ;;  %v791_v37 = vpack.i.bf16 %v270_v32, %v286_v33  ;;  %v209_v38 = vld [vmem:[%s1304_s1 + $0x40] sm:$0xff]  ;;  %v271_v39 = vld [vmem:[%s1037_s27 + $0x28] sm:$0xff]  ;;  %v208_v41 = vld [vmem:[%s1304_s1 + $0x38] sm:$0xff]  ;;  %p865_p5 = pnand %p864_p3, %p858_p0 }
  0x20   : > { %384 = vmatpush1.msra.mxu0 %v221_v17  ;;  %667 = vmatprep.subr.mxu1 %v222_v15  ;;  %v287_v40 = vld [vmem:[%s1037_s27 + $0xa8] sm:$0xff]  ;;  %v207_v42 = vld [vmem:[%s1304_s1 + $0x30] sm:$0xff]  ;;  %v205_v45 = vld [vmem:[%s1304_s1 + $0x20] sm:$0xff] }
  0x21   : > { %786 = vxpose.xlu0.b32.cont [2/16] (narrow) %v785_v16, 64  ;;  %385 = vmatprep.subr.mxu0 %v220_v20  ;;  %v206_v43 = vld [vmem:[%s1304_s1 + $0x28] sm:$0xff]  ;;  %v793_v44 = vpack.i.bf16 %v271_v39, %v287_v40  ;;  %v272_v46 = vld [vmem:[%s1037_s27 + $0x30] sm:$0xff]  ;;  %v204_v48 = vld [vmem:[%s1304_s1 + $0x18] sm:$0xff] }
  0x22   : > { %386 = vmatpush1.msra.mxu0 %v219_v21  ;;  %699 = vmatpush1.msra.mxu1 %v221_v17  ;;  %v288_v47 = vld [vmem:[%s1037_s27 + $0xb0] sm:$0xff]  ;;  %v202_v50 = vld [vmem:[%s1304_s1 + $0x8] sm:$0xff]  ;;  %v201_v52 = vld [vmem:[%s1304_s1] sm:$0xff] }
  0x23   : > { %387 = vmatprep.subr.mxu0 %v218_v22  ;;  %668 = vmatprep.subr.mxu1 %v220_v20  ;;  %v203_v49 = vld [vmem:[%s1304_s1 + $0x10] sm:$0xff]  ;;  %v795_v51 = vpack.i.bf16 %v272_v46, %v288_v47  ;;  %v273_v53 = vld [vmem:[%s1037_s27 + $0x38] sm:$0xff]  ;;  %v262_v57 = vld [vmem:[%s1304_s1 + $0x1e8] sm:$0xff] }
  0x24   : > { %388 = vmatpush1.msra.mxu0 %v217_v24  ;;  %700 = vmatpush1.msra.mxu1 %v219_v21  ;;  %v289_v54 = vld [vmem:[%s1037_s27 + $0xb8] sm:$0xff]  ;;  %v263_v56 = vld [vmem:[%s1304_s1 + $0x1f0] sm:$0xff]  ;;  %v261_v59 = vld [vmem:[%s1304_s1 + $0x1e0] sm:$0xff] }
  0x25   : > { %788 = vxpose.xlu0.b32.cont [3/16] (narrow) %v787_v23, 64  ;;  %389 = vmatprep.subr.mxu0 %v216_v27  ;;  %v264_v55 = vld [vmem:[%s1304_s1 + $0x1f8] sm:$0xff]  ;;  %v797_v58 = vpack.i.bf16 %v273_v53, %v289_v54  ;;  %v274_v60 = vld [vmem:[%s1037_s27 + $0x40] sm:$0xff]  ;;  %v259_v63 = vld [vmem:[%s1304_s1 + $0x1d0] sm:$0xff] }
  0x26   : > { %390 = vmatpush1.msra.mxu0 %v215_v28  ;;  %669 = vmatprep.subr.mxu1 %v218_v22  ;;  %v290_v61 = vld [vmem:[%s1037_s27 + $0xc0] sm:$0xff]  ;;  %v260_v62 = vld [vmem:[%s1304_s1 + $0x1d8] sm:$0xff]  ;;  %v258_v0 = vld [vmem:[%s1304_s1 + $0x1c8] sm:$0xff] }
  0x27   : > { %391 = vmatprep.subr.mxu0 %v214_v29  ;;  %701 = vmatpush1.msra.mxu1 %v217_v24  ;;  %v799_v1 = vpack.i.bf16 %v274_v60, %v290_v61  ;;  %v257_v2 = vld [vmem:[%s1304_s1 + $0x1c0] sm:$0xff]  ;;  %v275_v3 = vld [vmem:[%s1037_s27 + $0x48] sm:$0xff]  ;;  %v256_v5 = vld [vmem:[%s1304_s1 + $0x1b8] sm:$0xff] }
  0x28   : > { %392 = vmatpush1.msra.mxu0 %v213_v31  ;;  %670 = vmatprep.subr.mxu1 %v216_v27  ;;  %v291_v4 = vld [vmem:[%s1037_s27 + $0xc8] sm:$0xff]  ;;  %v255_v6 = vld [vmem:[%s1304_s1 + $0x1b0] sm:$0xff]  ;;  %v253_v9 = vld [vmem:[%s1304_s1 + $0x1a0] sm:$0xff] }
  0x29   : > { %790 = vxpose.xlu0.b32.cont [4/16] (narrow) %v789_v30, 64  ;;  %393 = vmatprep.subr.mxu0 %v212_v34  ;;  %v254_v7 = vld [vmem:[%s1304_s1 + $0x1a8] sm:$0xff]  ;;  %v801_v8 = vpack.i.bf16 %v275_v3, %v291_v4  ;;  %v276_v10 = vld [vmem:[%s1037_s27 + $0x50] sm:$0xff]  ;;  %v252_v12 = vld [vmem:[%s1304_s1 + $0x198] sm:$0xff] }
  0x2a   : > { %394 = vmatpush1.msra.mxu0 %v211_v35  ;;  %702 = vmatpush1.msra.mxu1 %v215_v28  ;;  %v292_v11 = vld [vmem:[%s1037_s27 + $0xd0] sm:$0xff]  ;;  %v250_v14 = vld [vmem:[%s1304_s1 + $0x188] sm:$0xff]  ;;  %v1184_v16 = vld [vmem:[%s1304_s1 + $0x180] sm:$0xff] }
  0x2b   : > { %395 = vmatprep.subr.mxu0 %v210_v36  ;;  %671 = vmatprep.subr.mxu1 %v214_v29  ;;  %v251_v13 = vld [vmem:[%s1304_s1 + $0x190] sm:$0xff]  ;;  %v803_v15 = vpack.i.bf16 %v276_v10, %v292_v11  ;;  %v277_v17 = vld [vmem:[%s1037_s27 + $0x58] sm:$0xff]  ;;  %v246_v21 = vld [vmem:[%s1304_s1 + $0x168] sm:$0xff]  ;;  %v933_v10 = vmov 0.0  }
  0x2c   : > { %396 = vmatpush1.msra.mxu0 %v209_v38  ;;  %703 = vmatpush1.msra.mxu1 %v213_v31  ;;  %v293_v18 = vld [vmem:[%s1037_s27 + $0xd8] sm:$0xff]  ;;  %v247_v20 = vld [vmem:[%s1304_s1 + $0x170] sm:$0xff]  ;;  %v245_v23 = vld [vmem:[%s1304_s1 + $0x160] sm:$0xff] }
  0x2d   : > { %792 = vxpose.xlu0.b32.cont [5/16] (narrow) %v791_v37, 64  ;;  %397 = vmatprep.subr.mxu0 %v208_v41  ;;  %v248_v19 = vld [vmem:[%s1304_s1 + $0x178] sm:$0xff]  ;;  %v805_v22 = vpack.i.bf16 %v277_v17, %v293_v18  ;;  %v278_v24 = vld [vmem:[%s1037_s27 + $0x60] sm:$0xff]  ;;  %v243_v27 = vld [vmem:[%s1304_s1 + $0x150] sm:$0xff] }
  0x2e   : > { %398 = vmatpush1.msra.mxu0 %v207_v42  ;;  %672 = vmatprep.subr.mxu1 %v212_v34  ;;  %v294_v25 = vld [vmem:[%s1037_s27 + $0xe0] sm:$0xff]  ;;  %v244_v26 = vld [vmem:[%s1304_s1 + $0x158] sm:$0xff]  ;;  %v242_v28 = vld [vmem:[%s1304_s1 + $0x148] sm:$0xff] }
  0x2f   : > { %399 = vmatprep.subr.mxu0 %v206_v43  ;;  %704 = vmatpush1.msra.mxu1 %v211_v35  ;;  %v807_v29 = vpack.i.bf16 %v278_v24, %v294_v25  ;;  %v241_v30 = vld [vmem:[%s1304_s1 + $0x140] sm:$0xff]  ;;  %v279_v31 = vld [vmem:[%s1037_s27 + $0x68] sm:$0xff]  ;;  %v240_v33 = vld [vmem:[%s1304_s1 + $0x138] sm:$0xff] }
  0x30   : > { %400 = vmatpush1.msra.mxu0 %v205_v45  ;;  %673 = vmatprep.subr.mxu1 %v210_v36  ;;  %v295_v32 = vld [vmem:[%s1037_s27 + $0xe8] sm:$0xff]  ;;  %v239_v34 = vld [vmem:[%s1304_s1 + $0x130] sm:$0xff]  ;;  %v237_v37 = vld [vmem:[%s1304_s1 + $0x120] sm:$0xff] }
  0x31   : > { %794 = vxpose.xlu0.b32.cont [6/16] (narrow) %v793_v44, 64  ;;  %401 = vmatprep.subr.mxu0 %v204_v48  ;;  %v238_v35 = vld [vmem:[%s1304_s1 + $0x128] sm:$0xff]  ;;  %v809_v36 = vpack.i.bf16 %v279_v31, %v295_v32  ;;  %v296_v39 = vld [vmem:[%s1037_s27 + $0xf0] sm:$0xff]  ;;  %v236_v40 = vld [vmem:[%s1304_s1 + $0x118] sm:$0xff] }
  0x32   : > { %402 = vmatpush1.msra.mxu0 %v203_v49  ;;  %705 = vmatpush1.msra.mxu1 %v209_v38  ;;  %v280_v38 = vld [vmem:[%s1037_s27 + $0x70] sm:$0xff]  ;;  %v233_v44 = vld [vmem:[%s1304_s1 + $0x100] sm:$0xff]  ;;  %v297_v46 = vld [vmem:[%s1037_s27 + $0xf8] sm:$0xff] }
  0x33   : > { %403 = vmatprep.subr.mxu0 %v202_v50  ;;  %674 = vmatprep.subr.mxu1 %v208_v41  ;;  %v235_v41 = vld [vmem:[%s1304_s1 + $0x110] sm:$0xff]  ;;  %v265_v17 = vld [vmem:[%s1305_s2] sm:$0x3] }
  0x34   : > { %404 = vmatpush1.msra.mxu0 %v201_v52  ;;  %706 = vmatpush1.msra.mxu1 %v207_v42  ;;  %v234_v42 = vld [vmem:[%s1304_s1 + $0x108] sm:$0xff] }
  0x35   : > { %796 = vxpose.xlu0.b32.cont [7/16] (narrow) %v795_v51, 64  ;;  %405 = vmatprep.subr.mxu0 %v264_v55 }
  0x36   : > { %406 = vmatpush2.msra.mxu0 %v263_v56  ;;  %675 = vmatprep.subr.mxu1 %v206_v43  ;;  %v811_v43 = vpack.i.bf16 %v280_v38, %v296_v39 }
  0x37   : > { %407 = vmatprep.subr.mxu0 %v262_v57  ;;  %707 = vmatpush1.msra.mxu1 %v205_v45  ;;  %v281_v45 = vld [vmem:[%s1037_s27 + $0x78] sm:$0xff] }
  0x38   : > { %408 = vmatpush2.msra.mxu0 %v261_v59  ;;  %676 = vmatprep.subr.mxu1 %v204_v48  ;;  %v813_v47 = vpack.i.bf16 %v281_v45, %v297_v46 }
  0x39   : > { %798 = vxpose.xlu0.b32.cont [8/16] (narrow) %v797_v58, 64  ;;  %409 = vmatprep.subr.mxu0 %v260_v62 }
  0x3a   : > { %410 = vmatpush2.msra.mxu0 %v259_v63  ;;  %708 = vmatpush1.msra.mxu1 %v203_v49 }
  0x3b   : > { %411 = vmatprep.subr.mxu0 %v258_v0  ;;  %677 = vmatprep.subr.mxu1 %v202_v50 }
  0x3c   : > { %412 = vmatpush2.msra.mxu0 %v257_v2  ;;  %709 = vmatpush1.msra.mxu1 %v201_v52 }
  0x3d   : > { %800 = vxpose.xlu0.b32.cont [9/16] (narrow) %v799_v1, 64  ;;  %413 = vmatprep.subr.mxu0 %v256_v5 }
  0x3e   : > { %414 = vmatpush2.msra.mxu0 %v255_v6  ;;  %678 = vmatprep.subr.mxu1 %v264_v55 }
  0x3f   : > { %415 = vmatprep.subr.mxu0 %v254_v7  ;;  %710 = vmatpush2.msra.mxu1 %v263_v56 }
  0x40   : > { %416 = vmatpush2.msra.mxu0 %v253_v9  ;;  %679 = vmatprep.subr.mxu1 %v262_v57 }
  0x41   : > { %802 = vxpose.xlu0.b32.cont [10/16] (narrow) %v801_v8, 64  ;;  %417 = vmatprep.subr.mxu0 %v252_v12  ;;  %v196_v8 = vlaneseq }
  0x42   : > { %418 = vmatpush2.msra.mxu0 %v251_v13  ;;  %711 = vmatpush2.msra.mxu1 %v261_v59 }
  0x43   : > { %419 = vmatprep.subr.mxu0 %v250_v14  ;;  %680 = vmatprep.subr.mxu1 %v260_v62  ;;  %vm1246_vm0 = vcmp.lt.s32.totalorder %v196_v8, 256 }
  0x44   : > { %420 = vmatpush2.msra.mxu0 %v1184_v16  ;;  %712 = vmatpush2.msra.mxu1 %v259_v63  ;;  %200 = vst.msk [vmem:[#allocation2] sm:$0x3] %vm1246_vm0, %v933_v10 }
  0x45   : > { %804 = vxpose.xlu0.b32.cont [11/16] (narrow) %v803_v15, 64  ;;  %421 = vmatprep.subr.mxu0 %v248_v19 }
  0x46   : > { %422 = vmatpush2.msra.mxu0 %v247_v20  ;;  %681 = vmatprep.subr.mxu1 %v258_v0 }
  0x47   : > { %423 = vmatprep.subr.mxu0 %v246_v21  ;;  %713 = vmatpush2.msra.mxu1 %v257_v2 }
  0x48   : > { %424 = vmatpush2.msra.mxu0 %v245_v23  ;;  %682 = vmatprep.subr.mxu1 %v256_v5 }
  0x49   : > { %806 = vxpose.xlu0.b32.cont [12/16] (narrow) %v805_v22, 64  ;;  %425 = vmatprep.subr.mxu0 %v244_v26 }
  0x4a   : > { %426 = vmatpush2.msra.mxu0 %v243_v27  ;;  %714 = vmatpush2.msra.mxu1 %v255_v6 }
  0x4b   : > { %427 = vmatprep.subr.mxu0 %v242_v28  ;;  %683 = vmatprep.subr.mxu1 %v254_v7 }
  0x4c   : > { %428 = vmatpush2.msra.mxu0 %v241_v30  ;;  %715 = vmatpush2.msra.mxu1 %v253_v9 }
  0x4d   : > { %808 = vxpose.xlu0.b32.cont [13/16] (narrow) %v807_v29, 64  ;;  %429 = vmatprep.subr.mxu0 %v240_v33 }
  0x4e   : > { %430 = vmatpush2.msra.mxu0 %v239_v34  ;;  %684 = vmatprep.subr.mxu1 %v252_v12 }
  0x4f   : > { %431 = vmatprep.subr.mxu0 %v238_v35  ;;  %716 = vmatpush2.msra.mxu1 %v251_v13  ;;  %v1252_v13 = vshrl.u32 %v196_v8, 7 }
  0x50   : > { %432 = vmatpush2.msra.mxu0 %v237_v37  ;;  %685 = vmatprep.subr.mxu1 %v250_v14 }
  0x51   : > { %810 = vxpose.xlu0.b32.cont [14/16] (narrow) %v809_v36, 64  ;;  %433 = vmatprep.subr.mxu0 %v236_v40  ;;  %v369_v18 = vsub.s32 1, %v1252_v13 }
  0x52   : > { %434 = vmatpush2.msra.mxu0 %v235_v41  ;;  %717 = vmatpush2.msra.mxu1 %v1184_v16  ;;  %v365_v16 = vsub.s32 0, %v1252_v13 }
  0x53   : > { %435 = vmatprep.subr.mxu0 %v234_v42  ;;  %686 = vmatprep.subr.mxu1 %v248_v19  ;;  %v370_v22 = vrot.slane %v265_v17, %v369_v18 }
  0x54   : > { %436 = vmatpush2.msra.mxu0 %v233_v44  ;;  %718 = vmatpush2.msra.mxu1 %v247_v20 }
  0x55   : > { %812 = vxpose.xlu0.b32.cont [15/16] (narrow) %v811_v43, 64  ;;  %687 = vmatprep.subr.mxu1 %v246_v21  ;;  %v366_v21 = vrot.slane %v265_v17, %v365_v16 }
  0x56   : > { %719 = vmatpush2.msra.mxu1 %v245_v23 }
  0x57   : > { %688 = vmatprep.subr.mxu1 %v244_v26 }
  0x58   : > { %720 = vmatpush2.msra.mxu1 %v243_v27 }
  0x59   : > { %814 = vxpose.xlu0.b32.end [16/16] (narrow) %v813_v47, 64  ;;  %689 = vmatprep.subr.mxu1 %v242_v28 }
  0x5a   : > { %721 = vmatpush2.msra.mxu1 %v241_v30 }
  0x5b   : > { %690 = vmatprep.subr.mxu1 %v240_v33 }
  0x5c   : > { %722 = vmatpush2.msra.mxu1 %v239_v34 }
  0x5d   : > { %691 = vmatprep.subr.mxu1 %v238_v35 }
  0x5e   : > { %723 = vmatpush2.msra.mxu1 %v237_v37 }
  0x5f   : > { %692 = vmatprep.subr.mxu1 %v236_v40 }
  0x60   : > { %724 = vmatpush2.msra.mxu1 %v235_v41 }
  0x61   : > { %693 = vmatprep.subr.mxu1 %v234_v42 }
  0x62   : > { %725 = vmatpush2.msra.mxu1 %v233_v44 }
  0x99   : > { %v815_v48 = vpop.trf.xlu0 }
  0x9a   : > { %v816_v49 = vunpack.i.l.bf16 %v815_v48  ;;  %v819_v50 = vunpack.i.h.bf16 %v815_v48 }
  0x9c   : > { %437 = vmatprep.mubr.f32.mxu0 %v816_v49 }
  0x9d   : > { %v820_v51 = vpop.trf.xlu0  ;;  %438 = vmatmul.mubr.f32.vlgmr.msra.gmra.mxu0 %v819_v50 }
  0x9e   : > { %v821_v52 = vunpack.i.l.bf16 %v820_v51  ;;  %v824_v53 = vunpack.i.h.bf16 %v820_v51 }
  0xa0   : > { %443 = vmatprep.mubr.f32.mxu0 %v821_v52 }
  0xa1   : > { %v825_v54 = vpop.trf.xlu0  ;;  %444 = vmatmul.mubr.f32.gmra.mxu0 %v824_v53 }
  0xa2   : > { %v826_v55 = vunpack.i.l.bf16 %v825_v54  ;;  %v829_v56 = vunpack.i.h.bf16 %v825_v54 }
  0xa4   : > { %449 = vmatprep.mubr.f32.mxu0 %v826_v55 }
  0xa5   : > { %v830_v57 = vpop.trf.xlu0  ;;  %450 = vmatmul.mubr.f32.gmra.mxu0 %v829_v56 }
  0xa6   : > { %v831_v58 = vunpack.i.l.bf16 %v830_v57  ;;  %v834_v59 = vunpack.i.h.bf16 %v830_v57 }
  0xa8   : > { %455 = vmatprep.mubr.f32.mxu0 %v831_v58 }
  0xa9   : > { %v835_v60 = vpop.trf.xlu0  ;;  %456 = vmatmul.mubr.f32.gmra.mxu0 %v834_v59 }
  0xaa   : > { %v836_v61 = vunpack.i.l.bf16 %v835_v60  ;;  %v839_v62 = vunpack.i.h.bf16 %v835_v60 }
  0xac   : > { %461 = vmatprep.mubr.f32.mxu1 %v836_v61 }
  0xad   : > { %v840_v63 = vpop.trf.xlu0  ;;  %462 = vmatmul.mubr.f32.vlgmr.msra.gmra.mxu1 %v839_v62 }
  0xae   : > { %v841_v0 = vunpack.i.l.bf16 %v840_v63  ;;  %v844_v1 = vunpack.i.h.bf16 %v840_v63 }
  0xb0   : > { %467 = vmatprep.mubr.f32.mxu1 %v841_v0 }
  0xb1   : > { %v845_v2 = vpop.trf.xlu0  ;;  %468 = vmatmul.mubr.f32.gmra.mxu1 %v844_v1 }
  0xb2   : > { %v846_v3 = vunpack.i.l.bf16 %v845_v2  ;;  %v849_v4 = vunpack.i.h.bf16 %v845_v2 }
  0xb4   : > { %473 = vmatprep.mubr.f32.mxu1 %v846_v3 }
  0xb5   : > { %v850_v5 = vpop.trf.xlu0  ;;  %474 = vmatmul.mubr.f32.gmra.mxu1 %v849_v4 }
  0xb6   : > { %v854_v6 = vunpack.i.h.bf16 %v850_v5  ;;  %v851_v7 = vunpack.i.l.bf16 %v850_v5 }
  0xb8   : > { %479 = vmatprep.mubr.f32.mxu1 %v851_v7 }
  0xb9   : > { %480 = vmatmul.mubr.f32.gmra.mxu1 %v854_v6 }
 0x15d   : > { %v439_v11 = vpop.f32.mrf.mxu0 }
 0x15e   : > { %v440_v26 = vadd.f32 %v439_v11, %v366_v21 }
 0x15f   : > { %v441_v12 = vpop.f32.mrf.mxu0 }
 0x160   : > { %v442_v29 = vadd.f32 %v441_v12, %v370_v22  ;;  %v486_v37 = vmax.f32 %v440_v26, 0.0 }
 0x161   : > { %v445_v14 = vpop.f32.mrf.mxu0 }
 0x162   : > { %v446_v24 = vadd.f32 %v445_v14, %v366_v21  ;;  %v487_v40 = vmax.f32 %v442_v29, 0.0 }
 0x163   : > { %v447_v15 = vpop.f32.mrf.mxu0 }
 0x164   : > { %v448_v25 = vadd.f32 %v447_v15, %v370_v22  ;;  %v488_v32 = vmax.f32 %v446_v24, 0.0  ;;  %v934_v24 = vmov 1966171168  }
 0x165   : > { %v451_v19 = vpop.f32.mrf.mxu0 }
 0x166   : > { %v452_v27 = vadd.f32 %v451_v19, %v366_v21  ;;  %v489_v34 = vmax.f32 %v448_v25, 0.0  ;;  %v503_v43 = vadd.f32 %v488_v32, %v486_v37  ;;  %v533_v25 = vunpack.c.l.s4 %v934_v24 }
 0x167   : > { %v453_v20 = vpop.f32.mrf.mxu0 }
 0x168   : > { %v454_v30 = vadd.f32 %v453_v20, %v370_v22  ;;  %v490_v38 = vmax.f32 %v452_v27, 0.0  ;;  %v516_v47 = vadd.f32 %v489_v34, %v487_v40  ;;  %v534_v29 = vunpack.c.0.s8 %v533_v25 }
 0x169   : > { %v457_v23 = vpop.f32.mrf.mxu0 }
 0x16a   : > { %v458_v33 = vadd.f32 %v457_v23, %v366_v21  ;;  %v491_v41 = vmax.f32 %v454_v30, 0.0  ;;  %v504_v50 = vadd.f32 %v503_v43, %v490_v38  ;;  %v537_v32 = vsub.s32 %v534_v29, %v1252_v13 }
 0x16b   : > { %v459_v28 = vpop.f32.mrf.mxu0 }
 0x16c   : > { %v460_v35 = vadd.f32 %v459_v28, %v370_v22  ;;  %v492_v44 = vmax.f32 %v458_v33, 0.0  ;;  %v517_v53 = vadd.f32 %v516_v47, %v491_v41 }
 0x16d   : > { %v463_v31 = vpop.f32.mrf.mxu1 }
 0x16e   : > { %v464_v39 = vadd.f32 %v463_v31, %v366_v21  ;;  %v493_v48 = vmax.f32 %v460_v35, 0.0  ;;  %v505_v55 = vadd.f32 %v504_v50, %v492_v44  ;;  %v502_v35 = vld [vmem:[#allocation2] sm:$0x3] }
 0x16f   : > { %v465_v36 = vpop.f32.mrf.mxu1 }
 0x170   : > { %v466_v45 = vadd.f32 %v465_v36, %v370_v22  ;;  %v494_v51 = vmax.f32 %v464_v39, 0.0  ;;  %v518_v59 = vadd.f32 %v517_v53, %v493_v48 }
 0x171   : > { %v469_v42 = vpop.f32.mrf.mxu1 }
 0x172   : > { %v470_v46 = vadd.f32 %v469_v42, %v366_v21  ;;  %v495_v56 = vmax.f32 %v466_v45, 0.0  ;;  %v506_v61 = vadd.f32 %v505_v55, %v494_v51 }
 0x173   : > { %v471_v49 = vpop.f32.mrf.mxu1 }
 0x174   : > { %v472_v52 = vadd.f32 %v471_v49, %v370_v22  ;;  %v496_v57 = vmax.f32 %v470_v46, 0.0  ;;  %v519_v2 = vadd.f32 %v518_v59, %v495_v56 }
 0x175   : > { %v475_v54 = vpop.f32.mrf.mxu1 }
 0x176   : > { %v476_v58 = vadd.f32 %v475_v54, %v366_v21  ;;  %v497_v62 = vmax.f32 %v472_v52, 0.0  ;;  %v507_v3 = vadd.f32 %v506_v61, %v496_v57 }
 0x177   : > { %v477_v60 = vpop.f32.mrf.mxu1 }
 0x178   : > { %v498_v63 = vmax.f32 %v476_v58, 0.0  ;;  %v478_v0 = vadd.f32 %v477_v60, %v370_v22  ;;  %v520_v7 = vadd.f32 %v519_v2, %v497_v62 }
 0x179   : > { %v481_v1 = vpop.f32.mrf.mxu1 }
 0x17a   : > { %v499_v4 = vmax.f32 %v478_v0, 0.0  ;;  %v482_v5 = vadd.f32 %v481_v1, %v366_v21  ;;  %v508_v8 = vadd.f32 %v507_v3, %v498_v63 }
 0x17b   : > { %v483_v6 = vpop.f32.mrf.mxu1 }
 0x17c   : > { %v500_v10 = vmax.f32 %v482_v5, 0.0  ;;  %v484_v11 = vadd.f32 %v483_v6, %v370_v22  ;;  %v521_v12 = vadd.f32 %v520_v7, %v499_v4 }
 0x17e   : > { %v509_v14 = vadd.f32 %v508_v8, %v500_v10  ;;  %v501_v15 = vmax.f32 %v484_v11, 0.0 }
 0x180   : > { %v510_v16 = vrot.slane %v509_v14, 4  ;;  %v522_v17 = vadd.f32 %v521_v12, %v501_v15 }
 0x182   : > { %v511_v18 = vadd.f32 %v510_v16, %v509_v14  ;;  %v523_v19 = vrot.slane %v522_v17, 4 }
 0x184   : > { %v512_v20 = vrot.slane %v511_v18, 2  ;;  %v524_v23 = vadd.f32 %v523_v19, %v522_v17 }
 0x186   : > { %v513_v26 = vadd.f32 %v512_v20, %v511_v18  ;;  %v525_v27 = vrot.slane %v524_v23, 2 }
 0x188   : > { %v514_v21 = vrot.slane %v513_v26, 1  ;;  %v526_v28 = vadd.f32 %v525_v27, %v524_v23 }
 0x18a   : > { %v527_v30 = vrot.slane %v526_v28, 1  ;;  %v515_v22 = vadd.f32 %v514_v21, %v513_v26 }
 0x18c   : > { %v528_v31 = vadd.f32 %v527_v30, %v526_v28 }
 0x18e   : > { %v531_v33 = vcombine.low %v515_v22, %v528_v31 }
 0x190   : > { %v538_v34 = vrot.slane %v531_v33, %v537_v32 }
 0x192   : > { %v545_v36 = vrot.slane %v538_v34, %v537_v32 }
 0x194   : > { %v547_v37 = vadd.f32 %v545_v36, %v502_v35 }
 0x196   : > { %552 = vst.msk [vmem:[#allocation2] sm:$0x3] %vm1246_vm0, %v547_v37 }
 0x19d   : > { %v556_v38 = vld [vmem:[#allocation2] sm:$0x3] }
 0x19e   : > { %v557_v39 = vmul.f32 0.015625, %v556_v38 }
 0x1a0   : > { %558 = vst.msk [vmem:[%s183_s7] sm:$0x3] %vm1246_vm0, %v557_v39 }
 0x1a1   : > { %868 = shalt.err (!%p865_p5)
}
 0x1a2   : > { %s869_s26 = scalar_lea.hbm %s572_s11, 32  ;;  %s873_s27 = scalar_lea.hbm %s1306_s3, 64 }
 0x1a3   : > { %p870_p6 = scmp.ne.s32.totalorder %s572_s11, %s869_s26  ;;  %p874_p10 = scmp.lt.s32.totalorder %s572_s11, %s1306_s3 }
 0x1a4   : > { %p875_p11 = scmp.lt.s32.totalorder %s873_s27, %s869_s26 }
 0x1a5   : > { %p871_p7 = pnand %p870_p6, %p996_p4 }
 0x1a6   : > { %p876_p12 = por %p875_p11, %p874_p10 }
 0x1a7   : > { %p872_p9 = pneg %p871_p7 }
 0x1a9   : > { %p877_p13 = pnand %p876_p12, %p872_p9 }
 0x1ab   : > { %880 = shalt.err (!%p877_p13)
}
 0x1ac   : > { %726 = dma.vmem_to_hbm [thread:$0]  (%p996_p4), %s575_s8, 32, %s572_s11, %s560_s18  }
 0x1ad PF: > { %p732_p0 = scmp.ge.s32.totalorder %s931_s17, 2  ;;  %s586_s5 = sand.u32 1, %s911_s12  }
 0x1ae   : > { %s587_s6 = scalar_lea.sflag [#allocation4], %s586_s5 }
 0x1af   : > { %p729_p1 = pnand %p732_p0, %p1003_p8 }
 0x1b1   : > { %p730_p2 = pneg %p729_p1 }
 0x1b3   : > { %906 = dma.done.wait (%p730_p2), %s587_s6, 32  }
 0x1b4   : > { %908 = vsyncadd (%p730_p2), %s587_s6, 4294967264  ;;  %s16_s17 = sadd.s32 1, %s931_s17   ;;  %s1311_s12 = smov %s915_s13 }
 0x1b5   : > { %p13_p3 = scmp.ge.s32.totalorder %s16_s17, 4   ;;  %s1312_s13 = smov %s919_s14 }
 0x1b6   : > { %s1313_s14 = smov %s1009_s25  ;;  %s1314_s15 = smov %s927_s16 }
 0x1b7   : > { %s1315_s16 = smov %s1317_s20  ;;  %15 = sbr.rel (!%p13_p3) target bundleno = 4 (0x4), region = 75 }
 0x1bc   :  { %592 = vsyncpa [#allocation4], 1 }
 0x1bd   :  { %594 = vsyncpa [#allocation4 + $0x1], 1 }

</bundles_post_ra>
